<compile_context>
chip_gen: v7x
topology: tpu7x:2x2x1
jax: 0.10.0
libtpu: 0.0.40
codegen_flags: <defaults>
</compile_context>

<pallas_src>
import functools

import jax
import jax.numpy as jnp
from jax import lax
from jax.experimental import pallas as pl
from jax.experimental.pallas import tpu as pltpu


def _round_up(x, m):
    return (x + m - 1) // m * m


def _choose_block_b(B, H, OUT_p, itemsize):
    """Largest batch tile (multiple of 8, <=1024) fitting a ~24 MiB tile budget."""
    budget = 24 * 1024 * 1024
    # double-buffered input rows + double-buffered output rows per batch row
    per_row = 2 * (H + OUT_p) * itemsize
    bb = max(8, min(1024, budget // max(per_row, 1)))
    bb = max(8, (bb // 8) * 8)
    bb = min(bb, _round_up(B, 8))
    return bb


def _lora_kernel(x_ref, wl_ref, wu_ref, o_ref, *, scaling):
    # x_ref : [TB, H]      batch tile of inputs (lane-dense on H)
    # wl_ref: [r, H]       low-projection weight, native PyTorch layout
    # wu_ref: [r, OUT_p]   up-projection weight, transposed + lane-padded
    # o_ref : [TB, OUT_p]
    x = x_ref[...]
    # low = x @ W_low.T  -> contract the H axis of both operands.
    low = lax.dot_general(
        x,
        wl_ref[...],
        dimension_numbers=(((1,), (1,)), ((), ())),
        preferred_element_type=jnp.float32,
    )  # [TB, r]
    # Scale the tiny intermediate (TB x r) instead of the TB x OUT output,
    # and cast back to the compute dtype so the second dot is MXU-native.
    low = (low * scaling).astype(x.dtype)
    out = jnp.dot(low, wu_ref[...], preferred_element_type=jnp.float32)  # [TB, OUT_p]
    o_ref[...] = out.astype(o_ref.dtype)


def lora_forward(inputs, w_low, w_up, alpha, r, *, block_b=None, training=False):
    """LoRA forward pass.

    inputs: [B, H]
    w_low : [r, H]    (PyTorch nn.Linear weight layout: [out_features, in_features])
    w_up  : [OUT, r]
    returns: [B, OUT]
    """
    if training:
        # TODO(synk): training-mode dropout (nn.Dropout) not implemented; inference path only.
        raise NotImplementedError("lora_forward implements the inference path only")

    B, H = inputs.shape
    r_dim, H_w = w_low.shape
    OUT, r_w = w_up.shape
    assert H == H_w and r_dim == r == r_w
    scaling = alpha / r

    itemsize = jnp.dtype(inputs.dtype).itemsize

    # Lane-dense output: pad OUT up to a multiple of 128 (zero columns, sliced off later).
    OUT_p = _round_up(OUT, 128)
    # Up-projection as [r, OUT_p] (OUT on the lane axis). Transposing the tiny
    # [OUT, r] weight is cheap; keeping it [OUT, r] would lane-pad r to 128.
    w_up_t = jnp.transpose(w_up)  # [r, OUT]
    if OUT_p != OUT:
        w_up_t = jnp.pad(w_up_t, ((0, 0), (0, OUT_p - OUT)))

    # Batch tiling (pad B so every grid step sees a full tile).
    if block_b is None:
        block_b = _choose_block_b(B, H, OUT_p, itemsize)
    block_b = max(8, (block_b // 8) * 8)
    B_p = _round_up(B, block_b)
    x = inputs
    if B_p != B:
        x = jnp.pad(x, ((0, B_p - B), (0, 0)))

    grid = (B_p // block_b,)

    kernel = functools.partial(_lora_kernel, scaling=scaling)

    cost = pl.CostEstimate(
        flops=2 * B_p * r * (H + OUT_p),
        transcendentals=0,
        bytes_accessed=(B_p * H + B_p * OUT_p + r * H + r * OUT_p) * itemsize,
    )

    out = pl.pallas_call(
        kernel,
        out_shape=jax.ShapeDtypeStruct((B_p, OUT_p), inputs.dtype),
        grid_spec=pltpu.PrefetchScalarGridSpec(
            num_scalar_prefetch=0,
            grid=grid,
            in_specs=[
                pl.BlockSpec((block_b, H), lambda i: (i, 0)),   # batch-tiled input
                pl.BlockSpec((r, H), lambda i: (0, 0)),         # full low weight (native [r, H])
                pl.BlockSpec((r, OUT_p), lambda i: (0, 0)),     # full up weight ([r, OUT_p])
            ],
            out_specs=pl.BlockSpec((block_b, OUT_p), lambda i: (i, 0)),
        ),
        compiler_params=pltpu.CompilerParams(
            dimension_semantics=("parallel",),
            vmem_limit_bytes=48 * 1024 * 1024,
        ),
        cost_estimate=cost,
    )(x, w_low, w_up_t)

    # Strip batch / lane padding.
    if B_p != B or OUT_p != OUT:
        out = out[:B, :OUT]
    return out


if __name__ == "__main__":
    # Small, deterministic example consistent with the module's forward.
    B, H = 8, 32            # batch, hidden (inputs.shape[1] in the module)
    r = 4                   # LoRA rank
    OUT = 32                # output_size
    alpha = 8.0             # -> scaling = alpha / r = 2.0
    # dropout_prob is irrelevant at inference (training=False).

    key = jax.random.PRNGKey(0)
    k_x, k_low, k_up = jax.random.split(key, 3)

    x = jax.random.normal(k_x, (B, H), dtype=jnp.float32)
    w_low = jax.random.normal(k_low, (r, H), dtype=jnp.float32) * 0.1   # Linear(H -> r).weight
    w_up = jax.random.normal(k_up, (OUT, r), dtype=jnp.float32) * 0.1   # Linear(r -> OUT).weight

    out = lora_forward(x, w_low, w_up, alpha, r)
    out = jax.block_until_ready(out)

    # Reference check in plain JAX (same math as the PyTorch forward).
    ref = (x @ w_low.T) @ w_up.T * (alpha / r)
    assert out.shape == (B, OUT)
    assert jnp.allclose(out, ref, atol=1e-5, rtol=1e-5), "mismatch vs reference"

    print("KERNEL_OK")
</pallas_src>

<mosaic_0001>
module attributes {stable_mosaic.version = 11 : i64} {
  func.func @_lora_kernel(%arg0: i32, %arg1: memref<8x32xf32, #tpu.memory_space<vmem>>, %arg2: memref<4x32xf32, #tpu.memory_space<vmem>>, %arg3: memref<4x128xf32, #tpu.memory_space<vmem>>, %arg4: memref<8x128xf32, #tpu.memory_space<vmem>>) attributes {dimension_semantics = [#tpu.dimension_semantics<parallel>], iteration_bounds = array<i64: 1>, scalar_prefetch = 0 : i64, scratch_operands = 0 : i64, tpu.core_type = #tpu.core_type<tc>, window_params = [{transform_indices = @transform_0, window_bounds = array<i64: 8, 32>}, {pipeline_mode = #tpu.pipeline_mode<synchronous>, transform_indices = @transform_1, window_bounds = array<i64: 4, 32>}, {pipeline_mode = #tpu.pipeline_mode<synchronous>, transform_indices = @transform_2, window_bounds = array<i64: 4, 128>}, {transform_indices = @transform_3, window_bounds = array<i64: 8, 128>}]} {
    %c0 = arith.constant 0 : index
    %c0_0 = arith.constant 0 : index
    %0 = vector.load %arg1[%c0, %c0_0] : memref<8x32xf32, #tpu.memory_space<vmem>>, vector<8x32xf32>
    %c0_1 = arith.constant 0 : index
    %c0_2 = arith.constant 0 : index
    %1 = vector.load %arg2[%c0_1, %c0_2] : memref<4x32xf32, #tpu.memory_space<vmem>>, vector<4x32xf32>
    %cst = arith.constant dense<0.000000e+00> : vector<8x4xf32>
    %2 = tpu.matmul %0, %1, %cst {dimension_numbers = #tpu.dot_dimension_numbers<[1], [1], [0], [0], [0, 0, 1, 0], [], []>} : vector<8x32xf32>, vector<4x32xf32>, vector<8x4xf32> -> vector<8x4xf32>
    %cst_3 = arith.constant 2.000000e+00 : f32
    %3 = vector.broadcast %cst_3 : f32 to vector<8x4xf32>
    %4 = arith.mulf %2, %3 : vector<8x4xf32>
    %c0_4 = arith.constant 0 : index
    %c0_5 = arith.constant 0 : index
    %5 = vector.load %arg3[%c0_4, %c0_5] : memref<4x128xf32, #tpu.memory_space<vmem>>, vector<4x128xf32>
    %cst_6 = arith.constant dense<0.000000e+00> : vector<8x128xf32>
    %6 = tpu.matmul %4, %5, %cst_6 {dimension_numbers = #tpu.dot_dimension_numbers<[1], [0], [0], [1], [0, 0, 1, 1], [], []>} : vector<8x4xf32>, vector<4x128xf32>, vector<8x128xf32> -> vector<8x128xf32>
    %c0_7 = arith.constant 0 : index
    %c0_8 = arith.constant 0 : index
    %7 = vector.load %arg4[%c0_7, %c0_8] : memref<8x128xf32, #tpu.memory_space<vmem>>, vector<8x128xf32>
    tpu.vector_store %arg4[%c0_7, %c0_8], %6 {strides = array<i32>} : memref<8x128xf32, #tpu.memory_space<vmem>>, vector<8x128xf32>,
    return
  }
  func.func @transform_0(%arg0: i32) -> (i32, i32) {
    %c0_i32 = arith.constant 0 : i32
    %c0_i32_0 = arith.constant 0 : i32
    return %arg0, %c0_i32 : i32, i32
  }
  func.func @transform_1(%arg0: i32) -> (i32, i32) {
    %c0_i32 = arith.constant 0 : i32
    %c0_i32_0 = arith.constant 0 : i32
    %c0_i32_1 = arith.constant 0 : i32
    return %c0_i32, %c0_i32_0 : i32, i32
  }
  func.func @transform_2(%arg0: i32) -> (i32, i32) {
    %c0_i32 = arith.constant 0 : i32
    %c0_i32_0 = arith.constant 0 : i32
    %c0_i32_1 = arith.constant 0 : i32
    return %c0_i32, %c0_i32_0 : i32, i32
  }
  func.func @transform_3(%arg0: i32) -> (i32, i32) {
    %c0_i32 = arith.constant 0 : i32
    %c0_i32_0 = arith.constant 0 : i32
    return %arg0, %c0_i32 : i32, i32
  }
}

</mosaic_0001>

<bundles_post_ra>
// kernel: tpu_custom_call.1
= control target key start
LH: loop header
LB: loop body
LE: loop exit
PB: predicated region body
PF: predicated region fallthrough
CT: control target
= control target key end

     0   :  { %8 = vsyncpa [#allocation3], 0  ;;  %s374_s0 = inlined_call_operand.hbm [shape: f32[8,32], index: 0, kind: input, shape index: {}]   ;;  %s375_s1 = inlined_call_operand.hbm [shape: f32[4,32], index: 1, kind: input, shape index: {}]   ;;  %s376_s2 = inlined_call_operand.vmem [shape: f32[4,128], index: 2, kind: input, shape index: {}]   ;;  %s377_s3 = inlined_call_operand.hbm [shape: f32[8,128], index: 3, kind: output, shape index: {}]  }
   0x1   :  { %9 = vsyncpa [#allocation6], 0 }
   0x2   :  { %10 = vsyncpa [#allocation4], 0  ;;  %s310_s12 = smov [#allocation2]   ;;  %s311_s14 = smov [#allocation5]  }
   0x3   :  { %s17_s13 = sshll.u32 %s310_s12, 4  ;;  %s27_s15 = sshll.u32 %s311_s14, 4  ;;  %s18_s13 = int_to_ptr.vmem [resolvable:$true] %s17_s13  ;;  %s28_s15 = int_to_ptr.vmem [resolvable:$true] %s27_s15 }
   0x4   :  { %s238_s18 = scalar_lea.hbm %s374_s0, 128 }
   0x5   :  { %p239_p0 = scmp.ne.s32.totalorder %s374_s0, %s238_s18  ;;  %p242_p1 = scmp.lt.u32.totalorder %s238_s18, %s374_s0 }
   0x7   :  { %p244_p2 = pnand %p242_p1, %p239_p0 }
   0x9   :  { %247 = shalt.err (!%p244_p2)
}
   0xa   :  { %s248_s23 = scalar_lea.vmem %s18_s13, 128  ;;  %p253_p4 = scmp.lt.s32.totalorder %s18_s13, %s18_s13 }
   0xb   :  { %p249_p3 = scmp.ne.s32.totalorder %s18_s13, %s248_s23  ;;  %p254_p5 = scmp.lt.s32.totalorder %s248_s23, %s248_s23 }
   0xd   :  { %p255_p6 = por %p254_p5, %p253_p4 }
   0xf   :  { %p256_p7 = pnand %p255_p6, %p249_p3 }
  0x11   :  { %259 = shalt.err (!%p256_p7)
}
  0x12   :  { %20 = dma.hbm_to_vmem [thread:$0]  %s374_s0, 128, %s18_s13, [#allocation3]  }
  0x13   :  { %s260_s28 = scalar_lea.hbm %s375_s1, 64 }
  0x14   :  { %p261_p8 = scmp.ne.s32.totalorder %s375_s1, %s260_s28  ;;  %p264_p9 = scmp.lt.u32.totalorder %s260_s28, %s375_s1 }
  0x16   :  { %p266_p10 = pnand %p264_p9, %p261_p8 }
  0x18   :  { %269 = shalt.err (!%p266_p10)
}
  0x19   :  { %s270_s6 = scalar_lea.vmem %s28_s15, 64  ;;  %p275_p12 = scmp.lt.s32.totalorder %s28_s15, %s28_s15 }
  0x1a   :  { %p271_p11 = scmp.ne.s32.totalorder %s28_s15, %s270_s6  ;;  %p276_p13 = scmp.lt.s32.totalorder %s270_s6, %s270_s6 }
  0x1c   :  { %p277_p0 = por %p276_p13, %p275_p12 }
  0x1e   :  { %p278_p1 = pnand %p277_p0, %p271_p11 }
  0x20   :  { %281 = shalt.err (!%p278_p1)
}
  0x21   :  { %30 = dma.hbm_to_vmem [thread:$0]  %s375_s1, 64, %s28_s15, [#allocation6]  }
  0x22   :  { %304 = dma.done.wait [#allocation3], 128  }
  0x23   :  { %305 = vsyncadd [#allocation3], 4294967168 }
  0x24   :  { %306 = dma.done.wait [#allocation6], 64  }
  0x25   :  { %307 = vsyncadd [#allocation6], 4294967232  ;;  %v312_v0 = vmov 0.0   ;;  %vm313_vm0 = vmmov 0   ;;  %vm41_vm1 = vcmask 261120   ;;  %v39_v2 = vld [vmem:[#allocation2] sm:$0xff] }
  0x26   :  { %223 = vmatprep.subr.mxu0 %v312_v0  ;;  %225 = vmatprep.mubr.msk.f32.mxu0 %vm313_vm0, %v312_v0  ;;  %v40_v1 = vld [vmem:[#allocation5] sm:$0xf]  ;;  %v119_v3 = vld [vmem:[%s376_s2] sm:$0xf]  ;;  %vm124_vm2 = vcmask 1043456   ;;  %vm120_vm3 = vcmask 31744  }
  0x27   :  { %228 = vmatprep.subr.mxu1 %v312_v0  ;;  %230 = vmatprep.mubr.msk.f32.mxu1 %vm313_vm0, %v312_v0  ;;  %s314_s1 = smov [#allocation7]  }
  0x28   :  { %224 = vmatpush3.xpose.msk.msra.mxu0 %vm41_vm1, %v40_v1  ;;  %229 = vmatpush3.msk.msra.mxu1 %vm124_vm2, %v119_v3  ;;  %s205_s10 = sshll.u32 %s314_s1, 4  ;;  %s206_s10 = int_to_ptr.vmem [resolvable:$true] %s205_s10 }
  0x29   :  { %s282_s11 = scalar_lea.vmem %s206_s10, 128  ;;  %p287_p3 = scmp.lt.s32.totalorder %s206_s10, %s206_s10 }
  0x2a   :  { %p283_p2 = scmp.ne.s32.totalorder %s206_s10, %s282_s11  ;;  %p288_p4 = scmp.lt.s32.totalorder %s282_s11, %s282_s11 }
  0x2b   :  { %226 = vmatmul.mubr.msk.f32.vlgmr.msra.gmra.mrb[0].mxu0 %vm41_vm1, %v39_v2 }
  0x2c   :  { %p289_p5 = por %p288_p4, %p287_p3 }
  0x2e   :  { %p290_p6 = pnand %p289_p5, %p283_p2 }
  0xfe   :  { %v114_v4 = vpop.f32.mrb[0].mxu0 }
  0xff   :  { %v118_v5 = vmul.f32 2.0, %v114_v4  ;;  %v227_v6 = vpop.f32.mrb[1].mxu0 }
 0x101   :  { %231 = vmatmul.mubr.msk.f32.vlgmr.msra.gmra.mrb[0].mxu1 %vm120_vm3, %v118_v5 }
 0x1d4   :  { %v194_v7 = vpop.f32.mrb[0].mxu1 }
 0x1d5   :  { %198 = vst [vmem:[#allocation7] sm:$0xff] %v194_v7  ;;  %v232_v8 = vpop.f32.mrb[1].mxu1 }
 0x1d6   :  { %293 = shalt.err (!%p290_p6)
}
 0x1d7   :  { %s294_s13 = scalar_lea.hbm %s377_s3, 128 }
 0x1d8   :  { %p295_p7 = scmp.ne.s32.totalorder %s377_s3, %s294_s13  ;;  %p298_p8 = scmp.lt.u32.totalorder %s294_s13, %s377_s3 }
 0x1da   :  { %p300_p9 = pnand %p298_p8, %p295_p7 }
 0x1dc   :  { %303 = shalt.err (!%p300_p9)
}
 0x1dd   :  { %208 = dma.vmem_to_hbm [thread:$0]  %s206_s10, 128, %s377_s3, [#allocation4]  }
 0x1de   :  { %308 = dma.done.wait [#allocation4], 128  }
 0x1df   :  { %309 = vsyncadd [#allocation4], 4294967168 }
 0x1e0   :  { %212 = vsyncpa [#allocation3], 1 }
 0x1e1   :  { %213 = vsyncpa [#allocation6], 1 }
 0x1e2   :  { %214 = vsyncpa [#allocation4], 1 }

</bundles_post_ra>
